<compile_context>
chip_gen: v7x
topology: tpu7x:2x2x1
jax: 0.10.0
libtpu: 0.0.40
codegen_flags: <defaults>
</compile_context>

<pallas_src>
import math
import functools

import jax
import jax.numpy as jnp
from jax.experimental import pallas as pl
from jax.experimental.pallas import tpu as pltpu


def _round_up(x, m):
    return ((x + m - 1) // m) * m


def _choose_tile(dim, align, cap):
    """Tile size <= cap minimizing round-up padding waste (ties -> larger tile).

    Candidates are the standard 128-multiples plus "whole (align-padded) dim as
    a single tile" when that fits under the cap.
    """
    cands = [c for c in (128, 256, 512, 1024) if c <= cap]
    full = _round_up(dim, align)
    if full <= cap:
        cands.append(full)
    best_key, best_tile = None, None
    for c in cands:
        key = (_round_up(dim, c) - dim, -c)  # (padding waste, prefer larger tile)
        if best_key is None or key < best_key:
            best_key, best_tile = key, c
    return best_tile


def _dense_kernel_accum_out(x_ref, w_ref, b_ref, o_ref):
    """f32 output block doubles as the accumulator (resident across the K axis)."""
    k = pl.program_id(2)

    @pl.when(k == 0)
    def _():
        # Seed the accumulator with the broadcast bias -> no epilogue bias add.
        o_ref[...] = jnp.broadcast_to(b_ref[...], o_ref.shape)

    # Cast after the DMA: bf16 fast path for the MXU (no-op on the exact path).
    x = x_ref[...].astype(w_ref.dtype)
    o_ref[...] += jnp.dot(x, w_ref[...], preferred_element_type=jnp.float32)


def _dense_kernel_scratch(x_ref, w_ref, b_ref, o_ref, acc_ref):
    """Narrow-dtype outputs: accumulate in an f32 VMEM scratch, cast in epilogue."""
    k = pl.program_id(2)

    @pl.when(k == 0)
    def _():
        acc_ref[...] = jnp.broadcast_to(b_ref[...], acc_ref.shape)

    x = x_ref[...].astype(w_ref.dtype)
    acc_ref[...] += jnp.dot(x, w_ref[...], preferred_element_type=jnp.float32)

    @pl.when(k == pl.num_programs(2) - 1)
    def _():
        o_ref[...] = acc_ref[...].astype(o_ref.dtype)


@functools.partial(jax.jit, static_argnames=("compute_dtype",))
def dense_forward(x, weight, bias, *, compute_dtype="bfloat16"):
    """sigma(x @ weight + bias) with identity sigma, no batchnorm.

    x:      (N, in_features)            (streamed as-is; cast happens in-kernel)
    weight: (in_features, out_features)
    bias:   (out_features,)
    compute_dtype: "bfloat16" (default fast MXU path, f32 accumulation) or
                   "float32"/None (exact PyTorch-parity path).
    """
    n, in_f = x.shape
    in_f_w, out_f = weight.shape
    assert in_f == in_f_w
    out_dtype = x.dtype

    exact = compute_dtype is None or jnp.dtype(compute_dtype) == jnp.float32
    w_dtype = jnp.float32 if exact else jnp.dtype(compute_dtype)
    # NOTE: in a real model the weight cast/pad below is parameter prep and
    # should be done once, not per forward call.
    weight = weight.astype(w_dtype)

    # ---- Tile selection (minimize padding waste, cap for VMEM budget) ----
    tk_cap = 512 if exact else 1024
    tm = _choose_tile(n, 8, 512)
    tn = _choose_tile(out_f, 128, 512)
    tk = _choose_tile(in_f, 128, tk_cap)

    mp = _round_up(n, tm)
    np_ = _round_up(out_f, tn)
    kp = _round_up(in_f, tk)

    # v7x megacore: guarantee >= 2 parallel (M, N) output tiles when possible.
    if (mp // tm) * (np_ // tn) < 2 and n >= 16:
        tm = _round_up(-(-mp // 2), 8)
        mp = _round_up(n, tm)

    # ---- Zero-pad to tile multiples (padded K contributes zeros) ----
    if (mp, kp) != (n, in_f):
        x = jnp.pad(x, ((0, mp - n), (0, kp - in_f)))
    if (kp, np_) != (in_f, out_f):
        weight = jnp.pad(weight, ((0, kp - in_f), (0, np_ - out_f)))
    bias2d = bias.astype(jnp.float32).reshape(1, out_f)
    if np_ != out_f:
        bias2d = jnp.pad(bias2d, ((0, 0), (0, np_ - out_f)))

    grid = (mp // tm, np_ // tn, kp // tk)
    grid_m, grid_n, grid_k = grid

    # f32 outputs accumulate directly in the resident output block; scratch
    # accumulator only for narrow output dtypes.
    use_scratch = jnp.dtype(out_dtype).itemsize < 4
    kernel = _dense_kernel_scratch if use_scratch else _dense_kernel_accum_out
    scratch_shapes = [pltpu.VMEM((tm, tn), jnp.float32)] if use_scratch else []

    # Deeper pipelining on the streamed operands only when the K loop is long.
    if grid_k > 4:
        x_spec = pl.BlockSpec((tm, tk), lambda i, j, k: (i, k),
                              pipeline_mode=pl.Buffered(3))
        w_spec = pl.BlockSpec((tk, tn), lambda i, j, k: (k, j),
                              pipeline_mode=pl.Buffered(3))
        n_buf = 3
    else:
        x_spec = pl.BlockSpec((tm, tk), lambda i, j, k: (i, k))
        w_spec = pl.BlockSpec((tk, tn), lambda i, j, k: (k, j))
        n_buf = 2

    out_itemsize = jnp.dtype(out_dtype).itemsize
    vmem_need = (
        n_buf * (tm * tk * x.dtype.itemsize + tk * tn * weight.dtype.itemsize)
        + 2 * (tm * tn * out_itemsize + tn * 4)
        + (tm * tn * 4 if use_scratch else 0)
    )
    # 48 MiB ceiling keeps headroom under v7x's 64 MiB physical VMEM while
    # lifting v5e's 16 MiB scoped default.
    vmem_limit = int(min(48 * 1024 * 1024, max(32 * 1024 * 1024, 2 * vmem_need)))

    flops = 2 * mp * np_ * kp
    bytes_accessed = (
        grid_n * mp * kp * x.dtype.itemsize          # x re-read once per N tile
        + grid_m * kp * np_ * weight.dtype.itemsize  # W re-read once per M tile
        + np_ * 4
        + mp * np_ * out_itemsize
    )

    out_padded = pl.pallas_call(
        kernel,
        out_shape=jax.ShapeDtypeStruct((mp, np_), out_dtype),
        grid_spec=pltpu.PrefetchScalarGridSpec(
            num_scalar_prefetch=0,
            grid=grid,
            in_specs=[
                x_spec,                                          # x tile
                w_spec,                                          # W tile
                pl.BlockSpec((1, tn), lambda i, j, k: (0, j)),   # bias tile
            ],
            out_specs=pl.BlockSpec((tm, tn), lambda i, j, k: (i, j)),
            scratch_shapes=scratch_shapes,
        ),
        compiler_params=pltpu.CompilerParams(
            dimension_semantics=("parallel", "parallel", "arbitrary"),
            vmem_limit_bytes=vmem_limit,
        ),
        cost_estimate=pl.CostEstimate(
            flops=flops, transcendentals=0, bytes_accessed=bytes_accessed
        ),
    )(x, weight, bias2d)

    if (mp, np_) != (n, out_f):
        out_padded = out_padded[:n, :out_f]
    return out_padded


def init_dense_params(key, in_features, out_features):
    """Mirror Dense.reset_parameters: uniform(-stdv, stdv), stdv = 1/sqrt(out_features)."""
    stdv = 1.0 / math.sqrt(out_features)
    kw, kb = jax.random.split(key)
    weight = jax.random.uniform(
        kw, (in_features, out_features), minval=-stdv, maxval=stdv, dtype=jnp.float32
    )
    bias = jax.random.uniform(
        kb, (out_features,), minval=-stdv, maxval=stdv, dtype=jnp.float32
    )
    return weight, bias


# TODO(synk): withbn=True branch (BatchNorm1d) is not implemented; module default
# (withbn=False, sigma=identity, bias=True) is what this kernel reproduces.


if __name__ == "__main__":
    key = jax.random.PRNGKey(0)
    k_x, k_p, k_x2, k_p2 = jax.random.split(key, 4)

    # GCN hidden-layer-style shape: 256 nodes, 128 -> 256 features.
    n, in_features, out_features = 256, 128, 256
    x = jax.random.normal(k_x, (n, in_features), dtype=jnp.float32)
    weight, bias = init_dense_params(k_p, in_features, out_features)
    ref = jnp.dot(x, weight, precision=jax.lax.Precision.HIGHEST) + bias

    # Default fast path: bf16 MXU operands, f32 accumulation.
    out_fast = jax.block_until_ready(dense_forward(x, weight, bias))
    assert out_fast.shape == (n, out_features)
    assert jnp.allclose(out_fast, ref, atol=5e-2, rtol=5e-2)

    # Exact-f32 parity path.
    out_f32 = jax.block_until_ready(
        dense_forward(x, weight, bias, compute_dtype="float32")
    )
    assert out_f32.shape == (n, out_features)
    assert jnp.allclose(out_f32, ref, atol=2e-3, rtol=2e-3)

    # Tiny, unaligned shape exercising the padding path (8x32 -> 16).
    n2, in_f2, out_f2 = 8, 32, 16
    x2 = jax.random.normal(k_x2, (n2, in_f2), dtype=jnp.float32)
    w2, b2 = init_dense_params(k_p2, in_f2, out_f2)
    ref2 = jnp.dot(x2, w2, precision=jax.lax.Precision.HIGHEST) + b2
    out_small = jax.block_until_ready(
        dense_forward(x2, w2, b2, compute_dtype="float32")
    )
    assert out_small.shape == (n2, out_f2)
    assert jnp.allclose(out_small, ref2, atol=2e-3, rtol=2e-3)

    print("KERNEL_OK")
</pallas_src>

<mosaic_0001>
module attributes {stable_mosaic.version = 11 : i64} {
  func.func @_dense_kernel_accum_out(%arg0: i32, %arg1: i32, %arg2: i32, %arg3: memref<128x128xf32, #tpu.memory_space<vmem>>, %arg4: memref<128x256xbf16, #tpu.memory_space<vmem>>, %arg5: memref<1x256xf32, #tpu.memory_space<vmem>>, %arg6: memref<128x256xf32, #tpu.memory_space<vmem>>) attributes {dimension_semantics = [#tpu.dimension_semantics<parallel>, #tpu.dimension_semantics<parallel>, #tpu.dimension_semantics<arbitrary>], iteration_bounds = array<i64: 2, 1, 1>, scalar_prefetch = 0 : i64, scratch_operands = 0 : i64, tpu.core_type = #tpu.core_type<tc>, window_params = [{transform_indices = @transform_0, window_bounds = array<i64: 128, 128>}, {transform_indices = @transform_1, window_bounds = array<i64: 128, 256>}, {transform_indices = @transform_2, window_bounds = array<i64: 1, 256>}, {transform_indices = @transform_3, window_bounds = array<i64: 128, 256>}]} {
    %c0_i32 = arith.constant 0 : i32
    %0 = arith.cmpi eq, %arg2, %c0_i32 : i32
    %1 = arith.extui %0 : i1 to i32
    %c0_i32_0 = arith.constant 0 : i32
    %2 = arith.cmpi ne, %1, %c0_i32_0 : i32
    scf.if %2 {
      %c0_8 = arith.constant 0 : index
      %c0_9 = arith.constant 0 : index
      %10 = vector.load %arg5[%c0_8, %c0_9] : memref<1x256xf32, #tpu.memory_space<vmem>>, vector<1x256xf32>
      %11 = vector.shape_cast %10 : vector<1x256xf32> to vector<1x256xf32>
      %12 = vector.broadcast %11 : vector<1x256xf32> to vector<128x256xf32>
      %c0_10 = arith.constant 0 : index
      %c0_11 = arith.constant 0 : index
      %13 = vector.load %arg6[%c0_10, %c0_11] : memref<128x256xf32, #tpu.memory_space<vmem>>, vector<128x256xf32>
      tpu.vector_store %arg6[%c0_10, %c0_11], %12 {strides = array<i32>} : memref<128x256xf32, #tpu.memory_space<vmem>>, vector<128x256xf32>,
    } else {
    }
    %c0 = arith.constant 0 : index
    %c0_1 = arith.constant 0 : index
    %3 = vector.load %arg3[%c0, %c0_1] : memref<128x128xf32, #tpu.memory_space<vmem>>, vector<128x128xf32>
    %4 = arith.truncf %3 : vector<128x128xf32> to vector<128x128xbf16>
    %c0_2 = arith.constant 0 : index
    %c0_3 = arith.constant 0 : index
    %5 = vector.load %arg6[%c0_2, %c0_3] : memref<128x256xf32, #tpu.memory_space<vmem>>, vector<128x256xf32>
    %c0_4 = arith.constant 0 : index
    %c0_5 = arith.constant 0 : index
    %6 = vector.load %arg4[%c0_4, %c0_5] : memref<128x256xbf16, #tpu.memory_space<vmem>>, vector<128x256xbf16>
    %cst = arith.constant dense<0.000000e+00> : vector<128x256xf32>
    %7 = tpu.matmul %4, %6, %cst {dimension_numbers = #tpu.dot_dimension_numbers<[1], [0], [0], [1], [0, 0, 1, 1], [], []>} : vector<128x128xbf16>, vector<128x256xbf16>, vector<128x256xf32> -> vector<128x256xf32>
    %8 = arith.addf %5, %7 : vector<128x256xf32>
    %c0_6 = arith.constant 0 : index
    %c0_7 = arith.constant 0 : index
    %9 = vector.load %arg6[%c0_6, %c0_7] : memref<128x256xf32, #tpu.memory_space<vmem>>, vector<128x256xf32>
    tpu.vector_store %arg6[%c0_6, %c0_7], %8 {strides = array<i32>} : memref<128x256xf32, #tpu.memory_space<vmem>>, vector<128x256xf32>,
    return
  }
  func.func @transform_0(%arg0: i32, %arg1: i32, %arg2: i32) -> (i32, i32) {
    %c0_i32 = arith.constant 0 : i32
    return %arg0, %arg2 : i32, i32
  }
  func.func @transform_1(%arg0: i32, %arg1: i32, %arg2: i32) -> (i32, i32) {
    %c0_i32 = arith.constant 0 : i32
    return %arg2, %arg1 : i32, i32
  }
  func.func @transform_2(%arg0: i32, %arg1: i32, %arg2: i32) -> (i32, i32) {
    %c0_i32 = arith.constant 0 : i32
    %c0_i32_0 = arith.constant 0 : i32
    return %c0_i32, %arg1 : i32, i32
  }
  func.func @transform_3(%arg0: i32, %arg1: i32, %arg2: i32) -> (i32, i32) {
    %c0_i32 = arith.constant 0 : i32
    return %arg0, %arg1 : i32, i32
  }
}

</mosaic_0001>

<bundles_post_ra>
// kernel: dense_forward.1
= control target key start
LH: loop header
LB: loop body
LE: loop exit
PB: predicated region body
PF: predicated region fallthrough
CT: control target
= control target key end

     0   :  { %8 = vsyncpa [#allocation3], 0  ;;  %s1274_s0 = inlined_call_operand.vmem [shape: f32[256,128], index: 0, kind: input, shape index: {}]   ;;  %s1275_s1 = inlined_call_operand.vmem [shape: bf16[128,256], index: 1, kind: input, shape index: {}]   ;;  %s1276_s2 = inlined_call_operand.vmem [shape: f32[1,256], index: 2, kind: input, shape index: {}]   ;;  %s1277_s3 = inlined_call_operand.hbm [shape: f32[256,256], index: 3, kind: output, shape index: {}]  }
   0x1   :  { %10 = vsyncpa [#allocation3 + $0x1], 0  ;;  %s1008_s12 = smov 0   ;;  %s1010_s13 = smov 0  }
   0x2   :  { %s1012_s14 = smov 0   ;;  %s1014_s15 = smov 0  }
   0x3   :  { %s1016_s16 = smov 0   ;;  %s1018_s17 = smov 0  }
   0x4 LB: > { %s772_s18 = sadd.s32 4294967295, %s982_s17   ;;  %s773_s19 = sadd.s32 4294967294, %s982_s17   ;;  %s982_s17 = sphi %s1018_s17, %s16_s17   ;;  %s978_s16 = sphi %s1016_s16, %s1284_s16   ;;  %s974_s15 = sphi %s1014_s15, %s1283_s15   ;;  %s970_s14 = sphi %s1012_s14, %s1282_s14   ;;  %s966_s13 = sphi %s1010_s13, %s1281_s13   ;;  %s962_s12 = sphi %s1008_s12, %s1280_s12  }
   0x5   : > { %s35_s20 = sadd.s32 1, %s978_s16  ;;  %s126_s21 = sadd.s32 1, %s970_s14 }
   0x6   : > { %p37_p0 = scmp.ge.s32.totalorder %s35_s20, 2  ;;  %p136_p1 = scmp.ne.s32.totalorder %s970_s14, %s966_s13 }
   0x7   : > { %p137_p2 = scmp.eq.s32.totalorder %s772_s18, 1  ;;  %p142_p3 = scmp.ne.s32.totalorder %s966_s13, %s962_s12 }
   0x8   : > { %s1286_s20 = smov (%p37_p0, %s35_s20), 0  ;;  %p143_p5 = scmp.eq.s32.totalorder %s773_s19, 1 }
   0x9   : > { %p1048_p4 = por %p137_p2, %p136_p1  ;;  %s121_s23 = ssub.s32 %s978_s16, %s1286_s20 }
   0xa   : > { %p778_p6 = scmp.ge.s32.totalorder %s982_s17, 1  ;;  %p124_p7 = scmp.eq.s32.totalorder %s121_s23, 0 }
   0xb   : > { %p1055_p8 = por %p143_p5, %p142_p3  ;;  %p196_p9 = scmp.lt.s32.totalorder %s982_s17, 3 }
   0xc   : > { %s1061_s25 = scalar_select %p124_p7, %s970_s14, %s126_s21  }
   0xd   : > { %p197_p10 = pnand %p778_p6, %p196_p9 }
   0xe   : > { %v880_v0 = vld [vmem:[%s1275_s1 + $0x4] ss:$8 sps:$4 sm:$0xff] (!%p197_p10)   ;;  %v882_v1 = vld [vmem:[%s1275_s1] ss:$8 sps:$4 sm:$0xff] (!%p197_p10)   ;;  %v984_v2 = vmov (!%p197_p10), 0   ;;  %s780_s19 = sshll.u32 (!%p197_p10), %s974_s15, 4  ;;  %v272_v41 = vlaneseq (!%p197_p10) }
   0xf   : > { %200 = sbr.rel (%p197_p10) target bundleno = 304 (0x130), region = 32  ;;  %498 = vmatprep.mubr.bf16.mxu0 (!%p197_p10), %v984_v2  ;;  %538 = vmatprep.mubr.bf16.mxu1 (!%p197_p10), %v984_v2  ;;  %v883_v3 = vld [vmem:[%s1275_s1 + $0x14] ss:$8 sps:$4 sm:$0xff] (!%p197_p10)   ;;  %v885_v4 = vld [vmem:[%s1275_s1 + $0x10] ss:$8 sps:$4 sm:$0xff] (!%p197_p10)   ;;  %p238_p11 = scmp.lt.s32.totalorder (!%p197_p10), %s780_s19, 31 }
  0x10   : > { %466 = vmatprep.subr.bf16.mxu0 (!%p197_p10), %v880_v0  ;;  %806 = vmatprep.subr.bf16.mxu1 (!%p197_p10), %v880_v0  ;;  %v886_v5 = vld [vmem:[%s1275_s1 + $0x24] ss:$8 sps:$4 sm:$0xff] (!%p197_p10)   ;;  %v888_v6 = vld [vmem:[%s1275_s1 + $0x20] ss:$8 sps:$4 sm:$0xff] (!%p197_p10)   ;;  %v889_v7 = vld [vmem:[%s1275_s1 + $0x34] ss:$8 sps:$4 sm:$0xff] (!%p197_p10)  }
  0x11   : > { %467 = vmatpush1.bf16.msra.mxu0 (!%p197_p10), %v882_v1  ;;  %814 = vmatpush1.bf16.msra.mxu1 (!%p197_p10), %v882_v1  ;;  %v891_v8 = vld [vmem:[%s1275_s1 + $0x30] ss:$8 sps:$4 sm:$0xff] (!%p197_p10)   ;;  %v892_v9 = vld [vmem:[%s1275_s1 + $0x44] ss:$8 sps:$4 sm:$0xff] (!%p197_p10)   ;;  %v894_v10 = vld [vmem:[%s1275_s1 + $0x40] ss:$8 sps:$4 sm:$0xff] (!%p197_p10)  }
  0x12   : > { %468 = vmatprep.subr.bf16.mxu0 (!%p197_p10), %v883_v3  ;;  %807 = vmatprep.subr.bf16.mxu1 (!%p197_p10), %v883_v3  ;;  %v895_v11 = vld [vmem:[%s1275_s1 + $0x54] ss:$8 sps:$4 sm:$0xff] (!%p197_p10)   ;;  %v897_v12 = vld [vmem:[%s1275_s1 + $0x50] ss:$8 sps:$4 sm:$0xff] (!%p197_p10)   ;;  %v898_v13 = vld [vmem:[%s1275_s1 + $0x64] ss:$8 sps:$4 sm:$0xff] (!%p197_p10)  }
  0x13   : > { %v900_v14 = vld [vmem:[%s1275_s1 + $0x60] ss:$8 sps:$4 sm:$0xff] (!%p197_p10)   ;;  %v901_v15 = vld [vmem:[%s1275_s1 + $0x74] ss:$8 sps:$4 sm:$0xff] (!%p197_p10)   ;;  %v903_v16 = vld [vmem:[%s1275_s1 + $0x70] ss:$8 sps:$4 sm:$0xff] (!%p197_p10)  }
  0x14   : > { %v273_v42 = vshrl.u32 (!%p197_p10), %v272_v41, 7  ;;  %s234_s29 = sand.u32 (!%p197_p10), 1, %s966_s13   ;;  %v270_v44 = vld [vmem:[%s1276_s2] sm:$0x3] (!%p197_p10)  ;;  %s805_s7 = sshll.u32 (!%p197_p10), %s974_s15, 12 }
  0x15   : > { %469 = vmatpush1.bf16.msra.mxu0 (!%p197_p10), %v885_v4  ;;  %815 = vmatpush1.bf16.msra.mxu1 (!%p197_p10), %v885_v4  ;;  %s779_s5 = sshll.u32 (!%p197_p10), %s234_s29, 8  ;;  %s1214_s10 = scalar_lea.hbm (!%p197_p10), %s1277_s3, %s805_s7 }
  0x16   : > { %470 = vmatprep.subr.bf16.mxu0 %v886_v5  ;;  %808 = vmatprep.subr.bf16.mxu1 %v886_v5  ;;  %s1288_s19 = smov (!%p238_p11, %s780_s19), 31  ;;  %v274_v43 = vsub.s32 0, %v273_v42  ;;  %v278_v45 = vsub.s32 1, %v273_v42  ;;  %s1155_s6 = scalar_lea.vmem [#allocation2], %s779_s5 }
  0x17   : > { %s781_s9 = sshll.u32 %s1288_s19, 3  ;;  %s660_s8 = sshll.u32 %s1155_s6, 4  ;;  %s1216_s8 = int_to_ptr.vmem [resolvable:$true] %s660_s8 }
  0x18   : > { %s1111_s23 = scalar_lea.vmem %s1274_s0, %s781_s9  ;;  %v1147_v46 = vrot.slane %v270_v44, %v274_v43  ;;  %v1149_v47 = vrot.slane %v270_v44, %v278_v45  ;;  %s1228_s11 = scalar_lea.sflag [#allocation3], %s234_s29 }
  0x19   : > { %471 = vmatpush1.bf16.msra.mxu0 %v888_v6  ;;  %816 = vmatpush1.bf16.msra.mxu1 %v888_v6  ;;  %v314_v17 = vld [vmem:[%s1111_s23] sm:$0xff]  ;;  %v315_v18 = vld [vmem:[%s1111_s23 + $0x8] sm:$0xff]  ;;  %v316_v23 = vld [vmem:[%s1111_s23 + $0x10] sm:$0xff]  ;;  %s904_s18 = scalar_lea.vmem %s1216_s8, 4096  ;;  %s985_s21 = smov [#allocation2]  }
  0x1a   : > { %472 = vmatprep.subr.bf16.mxu0 %v889_v7  ;;  %809 = vmatprep.subr.bf16.mxu1 %v889_v7  ;;  %v322_v19 = vld [vmem:[%s1111_s23 + $0x40] sm:$0xff]  ;;  %v323_v20 = vld [vmem:[%s1111_s23 + $0x48] sm:$0xff]  ;;  %v330_v21 = vpack.c.bf16 %v315_v18, %v314_v17  ;;  %v317_v24 = vld [vmem:[%s1111_s23 + $0x18] sm:$0xff]  ;;  %p905_p12 = scmp.ne.s32.totalorder %s1216_s8, %s904_s18 }
  0x1b   : > { %v334_v22 = vpack.c.bf16 %v323_v20, %v322_v19  ;;  %v324_v25 = vld [vmem:[%s1111_s23 + $0x50] sm:$0xff]  ;;  %v325_v26 = vld [vmem:[%s1111_s23 + $0x58] sm:$0xff]  ;;  %v331_v27 = vpack.c.bf16 %v317_v24, %v316_v23  ;;  %v318_v29 = vld [vmem:[%s1111_s23 + $0x20] sm:$0xff] }
  0x1c   : > { %v335_v28 = vpack.c.bf16 %v325_v26, %v324_v25  ;;  %v319_v30 = vld [vmem:[%s1111_s23 + $0x28] sm:$0xff]  ;;  %v326_v31 = vld [vmem:[%s1111_s23 + $0x60] sm:$0xff]  ;;  %v320_v35 = vld [vmem:[%s1111_s23 + $0x30] sm:$0xff]  ;;  %p906_p13 = pnand %p905_p12, %p1048_p4 }
  0x1d   : > { %473 = vmatpush1.bf16.msra.mxu0 %v891_v8  ;;  %817 = vmatpush1.bf16.msra.mxu1 %v891_v8  ;;  %v327_v32 = vld [vmem:[%s1111_s23 + $0x68] sm:$0xff]  ;;  %v332_v33 = vpack.c.bf16 %v319_v30, %v318_v29  ;;  %v321_v36 = vld [vmem:[%s1111_s23 + $0x38] sm:$0xff]  ;;  %v328_v37 = vld [vmem:[%s1111_s23 + $0x70] sm:$0xff] }
  0x1e   : > { %474 = vmatprep.subr.bf16.mxu0 %v892_v9  ;;  %810 = vmatprep.subr.bf16.mxu1 %v892_v9  ;;  %v336_v34 = vpack.c.bf16 %v327_v32, %v326_v31  ;;  %v329_v38 = vld [vmem:[%s1111_s23 + $0x78] sm:$0xff]  ;;  %v333_v39 = vpack.c.bf16 %v321_v36, %v320_v35  ;;  %p907_p0 = pneg %p906_p13  ;;  %s908_s23 = sshll.u32 %s985_s21, 4  ;;  %s909_s23 = int_to_ptr.vmem [resolvable:$false] %s908_s23 }
  0x1f   : > { %v337_v40 = vpack.c.bf16 %v329_v38, %v328_v37  ;;  %s910_s26 = scalar_lea.vmem %s909_s23, 8192  ;;  %p911_p1 = scmp.lt.s32.totalorder %s1216_s8, %s909_s23 }
  0x20   : > { %p912_p2 = scmp.lt.s32.totalorder %s910_s26, %s904_s18 }
  0x21   : > { %475 = vmatpush1.bf16.msra.mxu0 %v894_v10  ;;  %818 = vmatpush1.bf16.msra.mxu1 %v894_v10 }
  0x22   : > { %476 = vmatprep.subr.bf16.mxu0 %v895_v11  ;;  %811 = vmatprep.subr.bf16.mxu1 %v895_v11  ;;  %p913_p3 = por %p912_p2, %p911_p1 }
  0x24   : > { %p914_p5 = pnand %p913_p3, %p907_p0 }
  0x25   : > { %477 = vmatpush1.bf16.msra.mxu0 %v897_v12  ;;  %819 = vmatpush1.bf16.msra.mxu1 %v897_v12 }
  0x26   : > { %478 = vmatprep.subr.bf16.mxu0 %v898_v13  ;;  %812 = vmatprep.subr.bf16.mxu1 %v898_v13 }
  0x29   : > { %479 = vmatpush1.bf16.msra.mxu0 %v900_v14  ;;  %820 = vmatpush1.bf16.msra.mxu1 %v900_v14 }
  0x2a   : > { %480 = vmatprep.subr.bf16.mxu0 %v901_v15  ;;  %813 = vmatprep.subr.bf16.mxu1 %v901_v15 }
  0x2d   : > { %481 = vmatpush1.bf16.msra.mxu0 %v903_v16  ;;  %821 = vmatpush1.bf16.msra.mxu1 %v903_v16 }
  0x30   : > { %499 = vmatmul.mubr.bf16.vlgmr.msra.gmra.mrb[0].mxu0 %v330_v21  ;;  %539 = vmatmul.mubr.bf16.vlgmr.msra.gmra.mrb[0].mxu1 %v334_v22 }
  0x31   : > { %508 = vmatprep.mubr.bf16.mxu0 %v984_v2  ;;  %548 = vmatprep.mubr.bf16.mxu1 %v984_v2 }
  0x38   : > { %509 = vmatmul.mubr.bf16.gmra.mrb[4].mxu0 %v331_v27  ;;  %549 = vmatmul.mubr.bf16.gmra.mrb[4].mxu1 %v335_v28 }
  0x39   : > { %518 = vmatprep.mubr.bf16.mxu0 %v984_v2  ;;  %558 = vmatprep.mubr.bf16.mxu1 %v984_v2 }
  0x40   : > { %519 = vmatmul.mubr.bf16.gmra.mrb[8].mxu0 %v332_v33  ;;  %559 = vmatmul.mubr.bf16.gmra.mrb[8].mxu1 %v336_v34 }
  0x41   : > { %528 = vmatprep.mubr.bf16.mxu0 %v984_v2  ;;  %568 = vmatprep.mubr.bf16.mxu1 %v984_v2 }
  0x48   : > { %529 = vmatmul.mubr.bf16.gmra.mrb[12].mxu0 %v333_v39  ;;  %569 = vmatmul.mubr.bf16.gmra.mrb[12].mxu1 %v337_v40 }
 0x103   : > { %v500_v48 = vpop.f32.mrb[0].mxu0  ;;  %v540_v49 = vpop.f32.mrb[0].mxu1 }
 0x104   : > { %v579_v50 = vadd.f32 %v500_v48, %v1147_v46  ;;  %v595_v51 = vadd.f32 %v540_v49, %v1147_v46  ;;  %v502_v52 = vpop.f32.mrb[1].mxu0  ;;  %v542_v53 = vpop.f32.mrb[1].mxu1 }
 0x105   : > { %v580_v54 = vadd.f32 %v502_v52, %v1149_v47  ;;  %v596_v55 = vadd.f32 %v542_v53, %v1149_v47  ;;  %v504_v56 = vpop.f32.mrb[2].mxu0  ;;  %v544_v57 = vpop.f32.mrb[2].mxu1 }
 0x106   : > { %611 = vst [vmem:[%s1155_s6] sm:$0xff] %v579_v50  ;;  %627 = vst [vmem:[%s1155_s6 + $0x80] sm:$0xff] %v595_v51  ;;  %v581_v58 = vadd.f32 %v504_v56, %v1147_v46  ;;  %v597_v59 = vadd.f32 %v544_v57, %v1147_v46  ;;  %v506_v60 = vpop.f32.mrb[3].mxu0  ;;  %v546_v61 = vpop.f32.mrb[3].mxu1 }
 0x107   : > { %612 = vst [vmem:[%s1155_s6 + $0x8] sm:$0xff] %v580_v54  ;;  %628 = vst [vmem:[%s1155_s6 + $0x88] sm:$0xff] %v596_v55  ;;  %v582_v62 = vadd.f32 %v506_v60, %v1149_v47  ;;  %v598_v63 = vadd.f32 %v546_v61, %v1149_v47 }
 0x108   : > { %613 = vst [vmem:[%s1155_s6 + $0x10] sm:$0xff] %v581_v58  ;;  %629 = vst [vmem:[%s1155_s6 + $0x90] sm:$0xff] %v597_v59 }
 0x109   : > { %614 = vst [vmem:[%s1155_s6 + $0x18] sm:$0xff] %v582_v62  ;;  %630 = vst [vmem:[%s1155_s6 + $0x98] sm:$0xff] %v598_v63 }
 0x10b   : > { %v510_v0 = vpop.f32.mrb[4].mxu0  ;;  %v550_v1 = vpop.f32.mrb[4].mxu1 }
 0x10c   : > { %v583_v2 = vadd.f32 %v510_v0, %v1147_v46  ;;  %v599_v3 = vadd.f32 %v550_v1, %v1147_v46  ;;  %v512_v4 = vpop.f32.mrb[5].mxu0  ;;  %v552_v5 = vpop.f32.mrb[5].mxu1 }
 0x10d   : > { %v584_v6 = vadd.f32 %v512_v4, %v1149_v47  ;;  %v600_v7 = vadd.f32 %v552_v5, %v1149_v47  ;;  %v514_v8 = vpop.f32.mrb[6].mxu0  ;;  %v554_v9 = vpop.f32.mrb[6].mxu1 }
 0x10e   : > { %615 = vst [vmem:[%s1155_s6 + $0x20] sm:$0xff] %v583_v2  ;;  %631 = vst [vmem:[%s1155_s6 + $0xa0] sm:$0xff] %v599_v3  ;;  %v585_v10 = vadd.f32 %v514_v8, %v1147_v46  ;;  %v601_v11 = vadd.f32 %v554_v9, %v1147_v46  ;;  %v516_v12 = vpop.f32.mrb[7].mxu0  ;;  %v556_v13 = vpop.f32.mrb[7].mxu1 }
 0x10f   : > { %616 = vst [vmem:[%s1155_s6 + $0x28] sm:$0xff] %v584_v6  ;;  %632 = vst [vmem:[%s1155_s6 + $0xa8] sm:$0xff] %v600_v7  ;;  %v586_v14 = vadd.f32 %v516_v12, %v1149_v47  ;;  %v602_v15 = vadd.f32 %v556_v13, %v1149_v47 }
 0x110   : > { %617 = vst [vmem:[%s1155_s6 + $0x30] sm:$0xff] %v585_v10  ;;  %633 = vst [vmem:[%s1155_s6 + $0xb0] sm:$0xff] %v601_v11 }
 0x111   : > { %618 = vst [vmem:[%s1155_s6 + $0x38] sm:$0xff] %v586_v14  ;;  %634 = vst [vmem:[%s1155_s6 + $0xb8] sm:$0xff] %v602_v15 }
 0x113   : > { %v520_v16 = vpop.f32.mrb[8].mxu0  ;;  %v560_v17 = vpop.f32.mrb[8].mxu1 }
 0x114   : > { %v587_v18 = vadd.f32 %v520_v16, %v1147_v46  ;;  %v603_v19 = vadd.f32 %v560_v17, %v1147_v46  ;;  %v522_v20 = vpop.f32.mrb[9].mxu0  ;;  %v562_v21 = vpop.f32.mrb[9].mxu1 }
 0x115   : > { %v588_v22 = vadd.f32 %v522_v20, %v1149_v47  ;;  %v604_v23 = vadd.f32 %v562_v21, %v1149_v47  ;;  %v524_v24 = vpop.f32.mrb[10].mxu0  ;;  %v564_v25 = vpop.f32.mrb[10].mxu1 }
 0x116   : > { %619 = vst [vmem:[%s1155_s6 + $0x40] sm:$0xff] %v587_v18  ;;  %635 = vst [vmem:[%s1155_s6 + $0xc0] sm:$0xff] %v603_v19  ;;  %v589_v26 = vadd.f32 %v524_v24, %v1147_v46  ;;  %v605_v27 = vadd.f32 %v564_v25, %v1147_v46  ;;  %v526_v28 = vpop.f32.mrb[11].mxu0  ;;  %v566_v29 = vpop.f32.mrb[11].mxu1 }
 0x117   : > { %620 = vst [vmem:[%s1155_s6 + $0x48] sm:$0xff] %v588_v22  ;;  %636 = vst [vmem:[%s1155_s6 + $0xc8] sm:$0xff] %v604_v23  ;;  %v590_v30 = vadd.f32 %v526_v28, %v1149_v47  ;;  %v606_v31 = vadd.f32 %v566_v29, %v1149_v47 }
 0x118   : > { %621 = vst [vmem:[%s1155_s6 + $0x50] sm:$0xff] %v589_v26  ;;  %637 = vst [vmem:[%s1155_s6 + $0xd0] sm:$0xff] %v605_v27 }
 0x119   : > { %622 = vst [vmem:[%s1155_s6 + $0x58] sm:$0xff] %v590_v30  ;;  %638 = vst [vmem:[%s1155_s6 + $0xd8] sm:$0xff] %v606_v31 }
 0x11b   : > { %v530_v32 = vpop.f32.mrb[12].mxu0  ;;  %v570_v33 = vpop.f32.mrb[12].mxu1 }
 0x11c   : > { %v591_v34 = vadd.f32 %v530_v32, %v1147_v46  ;;  %v607_v35 = vadd.f32 %v570_v33, %v1147_v46  ;;  %v532_v36 = vpop.f32.mrb[13].mxu0  ;;  %v572_v37 = vpop.f32.mrb[13].mxu1 }
 0x11d   : > { %v592_v38 = vadd.f32 %v532_v36, %v1149_v47  ;;  %v608_v39 = vadd.f32 %v572_v37, %v1149_v47  ;;  %v534_v40 = vpop.f32.mrb[14].mxu0  ;;  %v574_v41 = vpop.f32.mrb[14].mxu1 }
 0x11e   : > { %623 = vst [vmem:[%s1155_s6 + $0x60] sm:$0xff] %v591_v34  ;;  %639 = vst [vmem:[%s1155_s6 + $0xe0] sm:$0xff] %v607_v35  ;;  %v593_v42 = vadd.f32 %v534_v40, %v1147_v46  ;;  %v609_v43 = vadd.f32 %v574_v41, %v1147_v46  ;;  %v536_v44 = vpop.f32.mrb[15].mxu0  ;;  %v576_v45 = vpop.f32.mrb[15].mxu1 }
 0x11f   : > { %624 = vst [vmem:[%s1155_s6 + $0x68] sm:$0xff] %v592_v38  ;;  %640 = vst [vmem:[%s1155_s6 + $0xe8] sm:$0xff] %v608_v39  ;;  %v594_v48 = vadd.f32 %v536_v44, %v1149_v47  ;;  %v610_v49 = vadd.f32 %v576_v45, %v1149_v47 }
 0x120   : > { %625 = vst [vmem:[%s1155_s6 + $0x70] sm:$0xff] %v593_v42  ;;  %641 = vst [vmem:[%s1155_s6 + $0xf0] sm:$0xff] %v609_v43 }
 0x121   : > { %626 = vst [vmem:[%s1155_s6 + $0x78] sm:$0xff] %v594_v48  ;;  %642 = vst [vmem:[%s1155_s6 + $0xf8] sm:$0xff] %v610_v49 }
 0x122   : > { %917 = shalt.err (!%p914_p5)
}
 0x123   : > { %s918_s27 = scalar_lea.hbm %s1214_s10, 4096  ;;  %s922_s29 = scalar_lea.hbm %s1277_s3, 8192 }
 0x124   : > { %p919_p6 = scmp.ne.s32.totalorder %s1214_s10, %s918_s27  ;;  %p923_p10 = scmp.lt.u32.totalorder %s1214_s10, %s1277_s3 }
 0x125   : > { %p924_p11 = scmp.lt.u32.totalorder %s922_s29, %s918_s27  ;;  %p926_p13 = scmp.lt.u32.totalorder %s918_s27, %s1214_s10 }
 0x126   : > { %p920_p7 = pnand %p919_p6, %p1048_p4 }
 0x127   : > { %p925_p12 = por %p924_p11, %p923_p10 }
 0x128   : > { %p921_p9 = pneg %p920_p7 }
 0x129   : > { %p927_p0 = por %p926_p13, %p925_p12 }
 0x12b   : > { %p928_p1 = pnand %p927_p0, %p921_p9 }
 0x12d   : > { %931 = shalt.err (!%p928_p1)
}
 0x12e   : > { %s986_s5 = smov 256   ;;  %s987_s6 = smov 16  }
 0x12f   : > { %822 = dma.vmem_to_hbm [thread:$0]  (%p1048_p4), %s1216_s8, 4096, %s1214_s10, %s1228_s11, %s986_s5, %s986_s5, %s987_s6  }
 0x130 PF: > { %p828_p2 = scmp.ge.s32.totalorder %s982_s17, 2  ;;  %s675_s7 = sand.u32 1, %s962_s12  }
 0x131   : > { %s676_s15 = scalar_lea.sflag [#allocation3], %s675_s7 }
 0x132   : > { %p825_p3 = pnand %p828_p2, %p1055_p8 }
 0x134   : > { %957 = dma.done.wait (!%p825_p3), %s676_s15, 4096  }
 0x135   : > { %959 = vsyncadd (!%p825_p3), %s676_s15, 4294963200  ;;  %s16_s17 = sadd.s32 1, %s982_s17   ;;  %s1280_s12 = smov %s966_s13 }
 0x136   : > { %p13_p5 = scmp.ge.s32.totalorder %s16_s17, 4   ;;  %s1281_s13 = smov %s970_s14 }
 0x137   : > { %s1282_s14 = smov %s1061_s25  ;;  %s1283_s15 = smov %s978_s16 }
 0x138   : > { %s1284_s16 = smov %s1286_s20  ;;  %15 = sbr.rel (!%p13_p5) target bundleno = 4 (0x4), region = 77 }
 0x13f   :  { %681 = vsyncpa [#allocation3], 1 }
 0x140   :  { %683 = vsyncpa [#allocation3 + $0x1], 1 }

</bundles_post_ra>
